<compile_context>
chip_gen: v6e
topology: v6e:2x2x1
jax: 0.10.0
libtpu: 0.0.40
codegen_flags: <defaults>
</compile_context>

<pallas_src>
import functools

import jax
import jax.numpy as jnp
from jax.experimental import pallas as pl
from jax.experimental.pallas import tpu as pltpu


def _coarse_bce_kernel(conf_ref, gt_ref, out_ref, *, tile_rows, total_elems):
    """Per-block partial BCE sum over a (tile_rows, 128) lane-dense tile."""
    i = pl.program_id(0)

    p = jnp.clip(conf_ref[...], 1e-6, 1.0 - 1e-6)
    y = gt_ref[...]
    bce = -(y * jnp.log(p) + (1.0 - y) * jnp.log(1.0 - p))

    # Mask out padded elements exactly (valid region is a prefix of the
    # flattened array).
    rows = jax.lax.broadcasted_iota(jnp.int32, (tile_rows, 128), 0)
    lanes = jax.lax.broadcasted_iota(jnp.int32, (tile_rows, 128), 1)
    flat_idx = (i * tile_rows + rows) * 128 + lanes
    bce = jnp.where(flat_idx < total_elems, bce, 0.0)

    # Reduce only across whole vregs (pure VALU adds); the final cross-lane /
    # cross-sublane reduction of the tiny (grid*8, 128) partials happens in
    # the wrapper.
    out_ref[...] = jnp.sum(bce.reshape(tile_rows // 8, 8, 128), axis=0)


def _coarse_bce_sum(conf, conf_gt, *, max_tile_rows=4096):
    """Sum of elementwise BCE over the full coarse confidence matrix."""
    assert max_tile_rows % 8 == 0

    total = int(conf.size)
    n_rows = pl.cdiv(total, 128)                       # rows of 128 lanes
    tile_rows = min(max_tile_rows, ((n_rows + 7) // 8) * 8)
    grid_steps = pl.cdiv(n_rows, tile_rows)
    rows_pad = grid_steps * tile_rows
    pad = rows_pad * 128 - total

    conf_2d = jnp.pad(conf.reshape(-1).astype(jnp.float32),
                      (0, pad)).reshape(rows_pad, 128)
    gt_2d = jnp.pad(conf_gt.reshape(-1).astype(jnp.float32),
                    (0, pad)).reshape(rows_pad, 128)

    kernel = functools.partial(_coarse_bce_kernel,
                               tile_rows=tile_rows,
                               total_elems=total)

    partials = pl.pallas_call(
        kernel,
        out_shape=jax.ShapeDtypeStruct((grid_steps * 8, 128), jnp.float32),
        grid_spec=pltpu.PrefetchScalarGridSpec(
            num_scalar_prefetch=0,
            grid=(grid_steps,),
            in_specs=[
                pl.BlockSpec((tile_rows, 128), lambda i: (i, 0)),  # conf
                pl.BlockSpec((tile_rows, 128), lambda i: (i, 0)),  # conf_gt
            ],
            out_specs=pl.BlockSpec((8, 128), lambda i: (i, 0)),
        ),
        compiler_params=pltpu.CompilerParams(
            dimension_semantics=("parallel",),
            vmem_limit_bytes=32 * 1024 * 1024,
        ),
    )(conf_2d, gt_2d)

    return jnp.sum(partials)


def rm_model_loss(data, loss_config):
    """JAX/Pallas equivalent of RMmodel_Loss.forward."""
    conf = data["conf_matrix"]
    conf_gt = data["conf_matrix_gt"]

    # ---- coarse loss: BCE on the confidence matrix (Pallas kernel) --------
    total = float(conf.size)
    loss_c = _coarse_bce_sum(conf, conf_gt) / total

    # ---- tiny side losses: plain JAX (a handful of elements each) ---------
    d = data["expec_f"] - data["expec_f_gt"]
    loss_f = jnp.mean(jnp.sum(d * d, axis=-1))

    de = data["E_pred"] - data["E_gt"]
    loss_e = jnp.mean(de * de)

    z = data["classif_logits"]
    lab = data["classif_labels"]
    loss_cls = jnp.mean(jnp.maximum(z, 0.0) - z * lab
                        + jnp.log1p(jnp.exp(-jnp.abs(z))))

    loss = (loss_config["coarse_weight"] * loss_c
            + loss_config["fine_weight"] * loss_f
            + loss_config["classif_weight"] * loss_cls
            + loss_config["essential_weight"] * loss_e)

    loss_scalars = {"loss": loss}
    data = dict(data)
    data.update({"loss": loss, "loss_scalars": loss_scalars})
    return data


def _reference_loss(data, loss_config):
    conf = jnp.clip(data["conf_matrix"], 1e-6, 1.0 - 1e-6)
    y = data["conf_matrix_gt"]
    loss_c = jnp.mean(-(y * jnp.log(conf) + (1.0 - y) * jnp.log(1.0 - conf)))

    d = data["expec_f"] - data["expec_f_gt"]
    loss_f = jnp.mean(jnp.sum(d * d, axis=-1))

    de = data["E_pred"] - data["E_gt"]
    loss_e = jnp.mean(de * de)

    z = data["classif_logits"]
    lab = data["classif_labels"]
    loss_cls = jnp.mean(jnp.maximum(z, 0.0) - z * lab
                        + jnp.log1p(jnp.exp(-jnp.abs(z))))

    return (loss_config["coarse_weight"] * loss_c
            + loss_config["fine_weight"] * loss_f
            + loss_config["classif_weight"] * loss_cls
            + loss_config["essential_weight"] * loss_e)


if __name__ == "__main__":
    key = jax.random.PRNGKey(0)
    k = jax.random.split(key, 8)

    # Deliberately non-multiple-of-128 coarse size to exercise the in-kernel
    # masking and the multi-step grid (with the small test tile below).
    N, L, S = 2, 48, 35
    M = 32
    B = 2

    data = {
        "conf_matrix": jax.nn.sigmoid(
            jax.random.normal(k[0], (N, L, S), jnp.float32)),
        "conf_matrix_gt": (jax.random.uniform(k[1], (N, L, S)) > 0.9
                           ).astype(jnp.float32),
        "expec_f": jax.random.normal(k[2], (M, 2), jnp.float32),
        "expec_f_gt": jax.random.normal(k[3], (M, 2), jnp.float32),
        "E_pred": jax.random.normal(k[4], (B, 9), jnp.float32),
        "E_gt": jax.random.normal(k[5], (B, 9), jnp.float32),
        "classif_logits": jax.random.normal(k[6], (M, 1), jnp.float32),
        "classif_labels": (jax.random.uniform(k[7], (M, 1)) > 0.5
                           ).astype(jnp.float32),
    }

    loss_config = {
        "coarse_weight": 1.0,
        "fine_weight": 0.5,
        "classif_weight": 0.25,
        "essential_weight": 0.1,
    }

    # Use a small tile for the test so the grid has >1 step and both the row
    # and lane masking paths are exercised.  Production uses the default
    # 4096-row (2 MiB) blocks.
    global _coarse_bce_sum_default
    _coarse_bce_sum_full = _coarse_bce_sum
    _coarse_bce_sum = functools.partial(_coarse_bce_sum_full, max_tile_rows=16)

    out = rm_model_loss(data, loss_config)
    loss = jax.block_until_ready(out["loss"])

    ref = _reference_loss(data, loss_config)
    assert jnp.allclose(loss, ref, rtol=1e-5, atol=1e-5), (loss, ref)

    print("KERNEL_OK")
</pallas_src>

<mosaic_0001>
module attributes {stable_mosaic.version = 11 : i64} {
  func.func @_coarse_bce_kernel(%arg0: i32, %arg1: memref<16x128xf32, #tpu.memory_space<vmem>>, %arg2: memref<16x128xf32, #tpu.memory_space<vmem>>, %arg3: memref<8x128xf32, #tpu.memory_space<vmem>>) attributes {dimension_semantics = [#tpu.dimension_semantics<parallel>], iteration_bounds = array<i64: 2>, scalar_prefetch = 0 : i64, scratch_operands = 0 : i64, tpu.core_type = #tpu.core_type<tc>, window_params = [{transform_indices = @transform_0, window_bounds = array<i64: 16, 128>}, {transform_indices = @transform_1, window_bounds = array<i64: 16, 128>}, {transform_indices = @transform_2, window_bounds = array<i64: 8, 128>}]} {
    %c0 = arith.constant 0 : index
    %c0_0 = arith.constant 0 : index
    %0 = vector.load %arg1[%c0, %c0_0] : memref<16x128xf32, #tpu.memory_space<vmem>>, vector<16x128xf32>
    %cst = arith.constant 9.99999997E-7 : f32
    %cst_1 = arith.constant 0.999998986 : f32
    %1 = vector.broadcast %cst : f32 to vector<16x128xf32>
    %2 = arith.maximumf %1, %0 : vector<16x128xf32>
    %3 = vector.broadcast %cst_1 : f32 to vector<16x128xf32>
    %4 = arith.minimumf %3, %2 : vector<16x128xf32>
    %c0_2 = arith.constant 0 : index
    %c0_3 = arith.constant 0 : index
    %5 = vector.load %arg2[%c0_2, %c0_3] : memref<16x128xf32, #tpu.memory_space<vmem>>, vector<16x128xf32>
    %6 = math.log %4 : vector<16x128xf32>
    %7 = arith.mulf %5, %6 : vector<16x128xf32>
    %cst_4 = arith.constant 1.000000e+00 : f32
    %8 = vector.broadcast %cst_4 : f32 to vector<16x128xf32>
    %9 = arith.subf %8, %5 : vector<16x128xf32>
    %cst_5 = arith.constant 1.000000e+00 : f32
    %10 = vector.broadcast %cst_5 : f32 to vector<16x128xf32>
    %11 = arith.subf %10, %4 : vector<16x128xf32>
    %12 = math.log %11 : vector<16x128xf32>
    %13 = arith.mulf %9, %12 : vector<16x128xf32>
    %14 = arith.addf %7, %13 : vector<16x128xf32>
    %cst_6 = arith.constant 0.000000e+00 : f32
    %15 = vector.broadcast %cst_6 : f32 to vector<16x128xf32>
    %16 = arith.subf %15, %14 : vector<16x128xf32>
    %17 = tpu.iota {dimensions = array<i32: 0>} : vector<16x128xi32>
    %18 = tpu.iota {dimensions = array<i32: 1>} : vector<16x128xi32>
    %c16_i32 = arith.constant 16 : i32
    %19 = arith.muli %arg0, %c16_i32 : i32
    %20 = vector.broadcast %19 : i32 to vector<16x128xi32>
    %21 = arith.addi %20, %17 : vector<16x128xi32>
    %c128_i32 = arith.constant 128 : i32
    %22 = vector.broadcast %c128_i32 : i32 to vector<16x128xi32>
    %23 = arith.muli %21, %22 : vector<16x128xi32>
    %24 = arith.addi %23, %18 : vector<16x128xi32>
    %c3360_i32 = arith.constant 3360 : i32
    %25 = vector.broadcast %c3360_i32 : i32 to vector<16x128xi32>
    %26 = arith.cmpi slt, %24, %25 : vector<16x128xi32>
    %cst_7 = arith.constant 0.000000e+00 : f32
    %27 = vector.broadcast %cst_7 : f32 to vector<16x128xf32>
    %28 = arith.select %26, %16, %27 : vector<16x128xi1>, vector<16x128xf32>
    %29 = vector.shape_cast %28 : vector<16x128xf32> to vector<2x8x128xf32>
    %cst_8 = arith.constant dense<0.000000e+00> : vector<8x128xf32>
    %30 = vector.multi_reduction <add>, %29, %cst_8 [0] : vector<2x8x128xf32> to vector<8x128xf32>
    %c0_9 = arith.constant 0 : index
    %c0_10 = arith.constant 0 : index
    %31 = vector.load %arg3[%c0_9, %c0_10] : memref<8x128xf32, #tpu.memory_space<vmem>>, vector<8x128xf32>
    tpu.vector_store %arg3[%c0_9, %c0_10], %30 {strides = array<i32>} : memref<8x128xf32, #tpu.memory_space<vmem>>, vector<8x128xf32>,
    return
  }
  func.func @transform_0(%arg0: i32) -> (i32, i32) {
    %c0_i32 = arith.constant 0 : i32
    %c0_i32_0 = arith.constant 0 : i32
    return %arg0, %c0_i32 : i32, i32
  }
  func.func @transform_1(%arg0: i32) -> (i32, i32) {
    %c0_i32 = arith.constant 0 : i32
    %c0_i32_0 = arith.constant 0 : i32
    return %arg0, %c0_i32 : i32, i32
  }
  func.func @transform_2(%arg0: i32) -> (i32, i32) {
    %c0_i32 = arith.constant 0 : i32
    %c0_i32_0 = arith.constant 0 : i32
    return %arg0, %c0_i32 : i32, i32
  }
}

</mosaic_0001>

<bundles_post_ra>
// kernel: tpu_custom_call.1
= control target key start
LH: loop header
LB: loop body
LE: loop exit
PB: predicated region body
PF: predicated region fallthrough
CT: control target
= control target key end

     0   :  { %7 = vsyncpa [#allocation3], 0  ;;  %s791_s0 = inlined_call_operand.hbm [shape: f32[32,128], index: 0, kind: input, shape index: {}]   ;;  %s792_s1 = inlined_call_operand.hbm [shape: f32[32,128], index: 1, kind: input, shape index: {}]   ;;  %s793_s2 = inlined_call_operand.hbm [shape: f32[16,128], index: 2, kind: output, shape index: {}]  }
   0x1   :  { %9 = vsyncpa [#allocation3 + $0x1], 0 }
   0x2   :  { %10 = vsyncpa [#allocation6], 0 }
   0x3   :  { %12 = vsyncpa [#allocation6 + $0x1], 0 }
   0x4   :  { %13 = vsyncpa [#allocation4], 0 }
   0x5   :  { %15 = vsyncpa [#allocation4 + $0x1], 0  ;;  %s585_s9 = smov 0   ;;  %s587_s10 = smov 0  }
   0x6   :  { %s589_s11 = smov 0   ;;  %s591_s12 = smov 0  }
   0x7 LB: > { %s606_s13 = sadd.s32 4294967295, %s563_s12   ;;  %s358_s14 = sadd.s32 4294967294, %s563_s12   ;;  %s563_s12 = sphi %s591_s12, %s809_s12   ;;  %s559_s11 = sphi %s589_s11, %s808_s11   ;;  %s555_s10 = sphi %s587_s10, %s807_s10   ;;  %s551_s9 = sphi %s585_s9, %s806_s9  }
   0x8   : > { %s610_s15 = sadd.s32 1, %s563_s12   ;;  %s28_s16 = sadd.s32 1, %s559_s11 }
   0x9   : > { %s25_s17 = ssub.s32 %s563_s12, %s610_s15  ;;  %p35_p0 = scmp.ne.s32.totalorder %s559_s11, %s555_s10 }
   0xa   : > { %p26_p1 = scmp.eq.s32.totalorder %s25_s17, 0  ;;  %p36_p2 = scmp.eq.s32.totalorder %s563_s12, 0 }
   0xb   : > { %p41_p3 = scmp.ne.s32.totalorder %s555_s10, %s551_s9  ;;  %p42_p4 = scmp.eq.s32.totalorder %s606_s13, 0 }
   0xc   : > { %s622_s18 = scalar_select %p26_p1, %s559_s11, %s28_s16  }
   0xd   : > { %p624_p5 = por %p36_p2, %p35_p0  ;;  %p628_p6 = por %p42_p4, %p41_p3 }
   0xe   : > { %p91_p7 = scmp.eq.s32.totalorder %s606_s13, 1  ;;  %p97_p8 = scmp.eq.s32.totalorder %s358_s14, 1 }
   0xf   : > { %s797_s20 = scalar_select %p628_p6, 1, 0 }
  0x10   : > { %p395_p10 = scmp.lt.s32.totalorder %s563_s12, 2  ;;  %p635_p11 = por %p91_p7, %p35_p0 }
  0x11   : > { %p639_p12 = por %p97_p8, %p41_p3  ;;  %s644_s23 = sand.u32 1, %s559_s11  }
  0x12   : > { %s798_s21 = scalar_select %p635_p11, 1, 0 }
  0x13   : > { %s799_s22 = scalar_select %p639_p12, 1, 0 }
  0x14   : > { %s376_s24 = sshll.u32 %s563_s12, 8  ;;  %s361_s25 = sshll.u32 %s644_s23, 4 }
  0x15   : > { %s653_s28 = scalar_lea.hbm %s791_s0, %s376_s24  ;;  %s121_s29 = scalar_lea.vmem [#allocation2], %s361_s25 }
  0x16   : > { %s128_s30 = sshll.u32 %s121_s29, 4  ;;  %p659_p13 = pnand %p395_p10, %p624_p5  ;;  %s663_s30 = int_to_ptr.vmem [resolvable:$true] %s128_s30 }
  0x17   : > { %s118_s4 = scalar_lea.sflag [#allocation3], %s644_s23  ;;  %s439_s5 = scalar_lea.hbm %s653_s28, 256 }
  0x18   : > { %p440_p0 = scmp.ne.s32.totalorder %s653_s28, %s439_s5  ;;  %p441_p1 = pneg %p659_p13 }
  0x19   : > { %s444_s8 = scalar_lea.hbm %s791_s0, 512  ;;  %p445_p4 = scmp.lt.s32.totalorder %s653_s28, %s791_s0 }
  0x1a   : > { %p442_p2 = pnand %p441_p1, %p440_p0  ;;  %p446_p5 = scmp.lt.s32.totalorder %s444_s8, %s439_s5 }
  0x1c   : > { %p443_p3 = pneg %p442_p2  ;;  %p447_p7 = por %p446_p5, %p445_p4 }
  0x1e   : > { %p448_p8 = pnand %p447_p7, %p443_p3 }
  0x20   : > { %451 = shalt.err (!%p448_p8)
}
  0x21   : > { %s452_s17 = scalar_lea.vmem %s663_s30, 256  ;;  %s565_s19 = smov [#allocation2]  }
  0x22   : > { %p453_p10 = scmp.ne.s32.totalorder %s663_s30, %s452_s17  ;;  %s457_s26 = sshll.u32 %s565_s19, 4  ;;  %s458_s26 = int_to_ptr.vmem [resolvable:$false] %s457_s26 }
  0x23   : > { %s459_s27 = scalar_lea.vmem %s458_s26, 512  ;;  %p460_p9 = scmp.lt.s32.totalorder %s663_s30, %s458_s26 }
  0x24   : > { %p455_p0 = pnand %p453_p10, %p441_p1  ;;  %p461_p12 = scmp.lt.s32.totalorder %s459_s27, %s452_s17 }
  0x26   : > { %p456_p2 = pneg %p455_p0  ;;  %p462_p11 = por %p461_p12, %p460_p9 }
  0x28   : > { %p463_p4 = pnand %p462_p11, %p456_p2 }
  0x2a   : > { %466 = shalt.err (!%p463_p4)
}
  0x2b   : > { %s566_s29 = smov 128   ;;  %s567_s5 = smov 8  }
  0x2c   : > { %387 = dma.hbm_to_vmem [thread:$0]  (!%p659_p13), %s653_s28, 256, %s663_s30, %s118_s4, %s566_s29, %s566_s29, %s567_s5  }
  0x2d   : > { %p367_p9 = scmp.ge.s32.totalorder %s563_s12, 1  ;;  %p157_p11 = scmp.lt.s32.totalorder %s563_s12, 3 }
  0x2e   : > { %s706_s14 = scalar_lea.hbm %s792_s1, %s376_s24  ;;  %s142_s16 = scalar_lea.vmem [#allocation5], %s361_s25 }
  0x2f   : > { %p697_p12 = pnand %p367_p9, %p157_p11  ;;  %s149_s17 = sshll.u32 %s142_s16, 4  ;;  %s710_s17 = int_to_ptr.vmem [resolvable:$true] %s149_s17 }
  0x30   : > { %s139_s28 = scalar_lea.sflag [#allocation6], %s644_s23  ;;  %s467_s30 = scalar_lea.hbm %s706_s14, 256 }
  0x31   : > { %p468_p3 = scmp.ne.s32.totalorder %s706_s14, %s467_s30  ;;  %s472_s24 = scalar_lea.hbm %s792_s1, 512 }
  0x32   : > { %p473_p8 = scmp.lt.s32.totalorder %s706_s14, %s792_s1  ;;  %p474_p10 = scmp.lt.s32.totalorder %s472_s24, %s467_s30 }
  0x33   : > { %p470_p5 = pnand %p468_p3, %p441_p1 }
  0x34   : > { %p475_p0 = por %p474_p10, %p473_p8 }
  0x35   : > { %p471_p7 = pneg %p470_p5 }
  0x37   : > { %p476_p2 = pnand %p475_p0, %p471_p7 }
  0x39   : > { %479 = shalt.err (!%p476_p2)
}
  0x3a   : > { %s480_s23 = scalar_lea.vmem %s710_s17, 256  ;;  %s568_s25 = smov [#allocation5]  }
  0x3b   : > { %p481_p4 = scmp.ne.s32.totalorder %s710_s17, %s480_s23  ;;  %s485_s7 = sshll.u32 %s568_s25, 4  ;;  %s486_s7 = int_to_ptr.vmem [resolvable:$false] %s485_s7 }
  0x3c   : > { %s487_s8 = scalar_lea.vmem %s486_s7, 512  ;;  %p488_p3 = scmp.lt.s32.totalorder %s710_s17, %s486_s7 }
  0x3d   : > { %p483_p9 = pnand %p481_p4, %p441_p1  ;;  %p489_p5 = scmp.lt.s32.totalorder %s487_s8, %s480_s23 }
  0x3f   : > { %p484_p11 = pneg %p483_p9  ;;  %p490_p6 = por %p489_p5, %p488_p3 }
  0x41   : > { %p491_p8 = pnand %p490_p6, %p484_p11 }
  0x43   : > { %494 = shalt.err (!%p491_p8)
}
  0x44   : > { %390 = dma.hbm_to_vmem [thread:$0]  (!%p659_p13), %s706_s14, 256, %s710_s17, %s139_s28, %s566_s29, %s566_s29, %s567_s5  }
  0x45   : > { %161 = sbr.rel (%p697_p12) target bundleno = 123 (0x7b), region = 28  ;;  %s741_s16 = sand.u32 (!%p697_p12), 1, %s555_s10  }
  0x46   : > { %s368_s30 = sshll.u32 (!%p697_p12), %s741_s16, 4  ;;  %s164_s4 = scalar_lea.sflag (!%p697_p12), [#allocation3], %s741_s16 }
  0x47   : > { %s167_s19 = scalar_lea.vmem (!%p697_p12), [#allocation2], %s368_s30  ;;  %p802_p6 = scmp.ne.s32.totalorder (!%p697_p12), %s797_s20, 0 }
  0x4a   : > { %538 = dma.done.wait (%p802_p6), %s164_s4, 256  }
  0x4b   : > { %540 = vsyncadd (%p802_p6), %s164_s4, 4294967040  ;;  %s173_s3 = scalar_lea.sflag [#allocation6], %s741_s16  ;;  %s176_s29 = scalar_lea.vmem [#allocation5], %s368_s30 }
  0x4c   : > { %542 = dma.done.wait (%p802_p6), %s173_s3, 256  }
  0x4d   : > { %544 = vsyncadd (%p802_p6), %s173_s3, 4294967040  ;;  %v204_v0 = vld [vmem:[%s167_s19] sm:$0xff]  ;;  %v205_v1 = vld [vmem:[%s167_s19 + $0x8] sm:$0xff]  ;;  %v232_v6 = vlaneseq  ;;  %s371_s5 = sshll.u32 %s606_s13, 4  ;;  %s370_s20 = sshll.u32 %s741_s16, 3 }
  0x4e   : > { %v206_v2 = vmax.f32 %v204_v0, 1e-06  ;;  %v207_v3 = vmax.f32 %v205_v1, 1e-06  ;;  %v238_v11 = vstv %s371_s5  ;;  %v210_v14 = vld [vmem:[%s176_s29] sm:$0xff]  ;;  %v211_v15 = vld [vmem:[%s176_s29 + $0x8] sm:$0xff] }
  0x4f   : > { %v233_v9 = vshrl.u32 %v232_v6, 7  ;;  %v236_v17 = vand.u32 127, %v232_v6  ;;  %v218_v21 = vsub.f32 1.0, %v210_v14  ;;  %v219_v25 = vsub.f32 1.0, %v211_v15  ;;  %s201_s6 = scalar_lea.vmem [#allocation7], %s370_s20  ;;  %s373_s17 = sshll.u32 %s606_s13, 7 }
  0x50   : > { %v208_v4 = vmin.f32 %v206_v2, 0.999999  ;;  %v209_v5 = vmin.f32 %v207_v3, 0.999999  ;;  %s265_s14 = sshll.u32 %s201_s6, 4  ;;  %s263_s26 = scalar_lea.hbm %s793_s2, %s373_s17  ;;  %s266_s14 = int_to_ptr.vmem [resolvable:$true] %s265_s14 }
  0x51   : > { %v234_v10 = vadd.s32 8, %v233_v9  ;;  %v239_v12 = vadd.s32 %v238_v11, %v233_v9  ;;  %s252_s27 = scalar_lea.sflag [#allocation4], %s741_s16  ;;  %s495_s23 = scalar_lea.vmem %s266_s14, 128 }
  0x52   : > { %431 = vlog2.f32 %v208_v4  ;;  %v220_v7 = vsub.f32 1.0, %v208_v4  ;;  %v221_v8 = vsub.f32 1.0, %v209_v5  ;;  %p496_p13 = scmp.ne.s32.totalorder %s266_s14, %s495_s23  ;;  %p803_p1 = scmp.ne.s32.totalorder %s798_s21, 0 }
  0x53   : > { %433 = vlog2.f32 %v209_v5  ;;  %v240_v13 = vadd.s32 %v238_v11, %v234_v10  ;;  %v241_v18 = vmul.u32 128, %v239_v12  ;;  %s569_s25 = smov [#allocation7]  }
  0x54   : > { %435 = vlog2.f32 %v220_v7  ;;  %p497_p12 = pnand %p496_p13, %p803_p1  ;;  %s499_s7 = sshll.u32 %s569_s25, 4  ;;  %s500_s7 = int_to_ptr.vmem [resolvable:$false] %s499_s7 }
  0x55   : > { %437 = vlog2.f32 %v221_v8  ;;  %v242_v22 = vmul.u32 128, %v240_v13  ;;  %v243_v31 = vadd.s32 %v241_v18, %v236_v17  ;;  %s501_s8 = scalar_lea.vmem %s500_s7, 256  ;;  %p502_p10 = scmp.lt.s32.totalorder %s266_s14, %s500_s7 }
  0x56   : > { %p498_p7 = pneg %p497_p12  ;;  %p503_p0 = scmp.lt.s32.totalorder %s501_s8, %s495_s23 }
  0x57   : > { %v244_v33 = vadd.s32 %v242_v22, %v236_v17  ;;  %vm245_vm0 = vcmp.lt.s32.totalorder %v243_v31, 3360 }
  0x58   : > { %p504_p2 = por %p503_p0, %p502_p10 }
  0x59   : > { %vm246_vm1 = vcmp.lt.s32.totalorder %v244_v33, 3360 }
  0x5a   : > { %p505_p4 = pnand %p504_p2, %p498_p7 }
  0x5f   : > { %v432_v16 = vpop.eup %431 }
  0x60   : > { %v434_v19 = vpop.eup %433  ;;  %v213_v20 = vmul.f32 0.6931472, %v432_v16 }
  0x61   : > { %v436_v23 = vpop.eup %435  ;;  %v215_v24 = vmul.f32 0.6931472, %v434_v19 }
  0x62   : > { %v438_v26 = vpop.eup %437  ;;  %v216_v27 = vmul.f32 %v213_v20, %v210_v14  ;;  %v223_v28 = vmul.f32 0.6931472, %v436_v23 }
  0x63   : > { %v217_v29 = vmul.f32 %v215_v24, %v211_v15  ;;  %v225_v30 = vmul.f32 0.6931472, %v438_v26 }
  0x64   : > { %v226_v32 = vmul.f32 %v223_v28, %v218_v21 }
  0x65   : > { %v227_v34 = vmul.f32 %v225_v30, %v219_v25 }
  0x66   : > { %v228_v35 = vadd.f32 %v226_v32, %v216_v27 }
  0x67   : > { %v229_v36 = vadd.f32 %v227_v34, %v217_v29 }
  0x68   : > { %v230_v37 = vsub.f32 0.0, %v228_v35 }
  0x69   : > { %v231_v38 = vsub.f32 0.0, %v229_v36 }
  0x6a   : > { %v247_v39 = vsel %vm245_vm0, %v230_v37, 0.0 }
  0x6b   : > { %v248_v40 = vsel %vm246_vm1, %v231_v38, 0.0 }
  0x6c   : > { %v249_v41 = vadd.f32 %v248_v40, %v247_v39 }
  0x6e   : > { %250 = vst [vmem:[%s201_s6] sm:$0xff] %v249_v41 }
  0x6f   : > { %508 = shalt.err (!%p505_p4)
}
  0x70   : > { %s509_s13 = scalar_lea.hbm %s263_s26, 128  ;;  %s513_s4 = scalar_lea.hbm %s793_s2, 256 }
  0x71   : > { %p510_p9 = scmp.ne.s32.totalorder %s263_s26, %s509_s13  ;;  %p514_p5 = scmp.lt.s32.totalorder %s263_s26, %s793_s2 }
  0x72   : > { %p515_p8 = scmp.lt.s32.totalorder %s513_s4, %s509_s13 }
  0x73   : > { %p511_p11 = pnand %p510_p9, %p803_p1 }
  0x74   : > { %p516_p6 = por %p515_p8, %p514_p5 }
  0x75   : > { %p512_p3 = pneg %p511_p11 }
  0x77   : > { %p517_p13 = pnand %p516_p6, %p512_p3 }
  0x79   : > { %520 = shalt.err (!%p517_p13)
}
  0x7a   : > { %382 = dma.vmem_to_hbm [thread:$0]  (%p803_p1), %s266_s14, 128, %s263_s26, %s252_s27  }
  0x7b PF: > { %s277_s29 = sand.u32 1, %s551_s9   ;;  %p804_p12 = scmp.ne.s32.totalorder %s799_s22, 0 }
  0x7c   : > { %p805_p7 = scmp.ge.s32.totalorder %s563_s12, 2  ;;  %s278_s5 = scalar_lea.sflag [#allocation4], %s277_s29 }
  0x7e   : > { %p392_p10 = pnand %p805_p7, %p804_p12 }
  0x80   : > { %p393_p0 = pneg %p392_p10 }
  0x82   : > { %546 = dma.done.wait (%p393_p0), %s278_s5, 128  }
  0x83   : > { %548 = vsyncadd (%p393_p0), %s278_s5, 4294967168  ;;  %p18_p2 = scmp.ge.s32.totalorder %s610_s15, 4   ;;  %s806_s9 = smov %s555_s10 }
  0x84   : > { %s807_s10 = smov %s559_s11  ;;  %s808_s11 = smov %s622_s18 }
  0x85   : > { %s809_s12 = smov %s610_s15  ;;  %20 = sbr.rel (!%p18_p2) target bundleno = 7 (0x7), region = 86 }
  0x8a   :  { %283 = vsyncpa [#allocation3], 1 }
  0x8b   :  { %285 = vsyncpa [#allocation3 + $0x1], 1 }
  0x8c   :  { %286 = vsyncpa [#allocation6], 1 }
  0x8d   :  { %288 = vsyncpa [#allocation6 + $0x1], 1 }
  0x8e   :  { %289 = vsyncpa [#allocation4], 1 }
  0x8f   :  { %291 = vsyncpa [#allocation4 + $0x1], 1 }

</bundles_post_ra>
